<compile_context>
chip_gen: v5e
topology: v5e:2x2
jax: 0.10.0
libtpu: 0.0.40
codegen_flags: <defaults>
</compile_context>

<pallas_src>
import math

import jax
import jax.numpy as jnp
from jax.experimental import pallas as pl
from jax.experimental.pallas import tpu as pltpu


_LANE = 128                  # vreg lane width (same on v5e/v6e/v7x)
_SINGLE_TILE_MAX = 2048      # below this many rows: one grid step
_VMEM_SOFT_CAP = 48 << 20    # stay well under v7x's 64 MiB physical VMEM


def _round_up(a, b):
    return ((a + b - 1) // b) * b


def _make_fused_mlp_kernel(num_layers):
    """relu(W_L @ ... relu(W_1 @ x + b_1) ... + b_L) for one [C, TM] column tile.

    Channel-major layout: channels on the sublane axis, rows (TM, a multiple
    of 128) on the lane axis -> lane-dense vregs, contiguous DMAs, unmasked
    stores.  Intermediate activations stay in f32 inside VMEM/vregs.
    """

    def kernel(x_ref, *refs):
        o_ref = refs[-1]
        h = x_ref[...]                                   # [C_in, TM]
        for l in range(num_layers):
            w = refs[2 * l][...]                         # [C_out, C_in] (param dtype)
            b = refs[2 * l + 1][...]                     # [C_out, 1]    (f32)
            lhs = h if h.dtype == w.dtype else h.astype(w.dtype)
            h = jnp.dot(w, lhs, preferred_element_type=jnp.float32)  # [C_out, TM]
            # ReLU after EVERY layer (matches how the reference Sequential is built).
            h = jnp.maximum(h + b, 0.0)
        o_ref[...] = h.astype(o_ref.dtype)

    return kernel


def mlp_forward_cm(x_cm, params, *, tile_n=1024, io_dtype=None):
    """Fused MLP forward on a channel-major input (no extra XLA ops).

    x_cm:   [C0, N]  channels on the sublane axis, rows on the lane axis.
    params: list of (w [C_out, C_in] in its compute dtype, b [C_out, 1] f32).
    Returns [C_last, N_pad]; columns >= N are padding (consumer may slice or
    simply accept the padded slab — no post-call slice happens here).
    """
    if io_dtype is None:
        io_dtype = x_cm.dtype
    c0, n = x_cm.shape
    assert c0 == params[0][0].shape[1], "channel mismatch"
    c_last = params[-1][0].shape[0]
    num_layers = len(params)

    # --- pick a lane-aligned column tile ------------------------------------
    n_eff = max(n, _LANE)
    if n_eff <= _SINGLE_TILE_MAX:
        num_tiles = 1                                    # one grid step: per-step
        tm = _round_up(n_eff, _LANE)                     # overhead dominates here
    else:
        num_tiles = -(-n_eff // tile_n)
        if num_tiles % 2 == 1:
            num_tiles += 1                               # even tile count keeps
        tm = _round_up(-(-n_eff // num_tiles), _LANE)    # both v7x TCs busy
    n_pad = tm * num_tiles

    x_p = x_cm.astype(io_dtype)
    if n_pad != n:
        x_p = jnp.pad(x_p, ((0, 0), (0, n_pad - n)))

    # --- specs: x/out tiled along lanes; params whole-array & VMEM-resident --
    in_specs = [pl.BlockSpec((c0, tm), lambda i: (0, i))]
    flat_params = []
    for (w, b) in params:
        co, ci = w.shape
        in_specs.append(pl.BlockSpec((co, ci), lambda i: (0, 0)))
        in_specs.append(pl.BlockSpec((co, 1), lambda i: (0, 0)))
        flat_params.append(w)          # already in param dtype (cast at init)
        flat_params.append(b)          # already [C_out, 1] f32 (shaped at init)
    out_spec = pl.BlockSpec((c_last, tm), lambda i: (0, i))

    # --- VMEM budget: double-buffered x/out tiles + resident weights/biases --
    io_bytes = jnp.dtype(io_dtype).itemsize
    vmem_bytes = 2 * tm * (c0 + c_last) * io_bytes
    for (w, b) in params:
        vmem_bytes += w.size * w.dtype.itemsize + b.size * 4
    assert vmem_bytes < _VMEM_SOFT_CAP, (
        f"MLP weights + tiles ({vmem_bytes / 2**20:.1f} MiB) do not fit "
        "comfortably in VMEM (v7x has 64 MiB); shrink tile_n or stop keeping "
        "every layer's weights resident.")
    compiler_params = pltpu.CompilerParams(
        dimension_semantics=("parallel",),   # shard row tiles across v7x TCs
        vmem_limit_bytes=min(_VMEM_SOFT_CAP, max(32 << 20, 2 * vmem_bytes)),
    )

    return pl.pallas_call(
        _make_fused_mlp_kernel(num_layers),
        out_shape=jax.ShapeDtypeStruct((c_last, n_pad), io_dtype),
        grid=(num_tiles,),
        in_specs=in_specs,
        out_specs=out_spec,
        compiler_params=compiler_params,
    )(x_p, *flat_params)


def mlp_forward(x, params, *, tile_n=1024, io_dtype=None):
    """Row-major convenience wrapper: x [N, C0] -> [N, C_last].

    The transpose/pad/slice here is wrapper-side layout plumbing (one cheap
    XLA transpose each way); the kernel only ever sees lane-dense tiles.
    Callers that can produce/consume channel-major data should use
    mlp_forward_cm directly and skip this plumbing entirely.
    """
    n = x.shape[0]
    y_cm = mlp_forward_cm(x.T, params, tile_n=tile_n, io_dtype=io_dtype)
    return y_cm[:, :n].T


def init_mlp_params(channels, key, param_dtype=jnp.float32):
    """torch.nn.Linear-style init.  Weights stored [C_out, C_in] in
    param_dtype, biases stored [C_out, 1] float32 — all casts/reshapes happen
    exactly once here, never per forward call."""
    params = []
    for i in range(1, len(channels)):
        c_in, c_out = channels[i - 1], channels[i]
        key, kw, kb = jax.random.split(key, 3)
        bound = 1.0 / math.sqrt(c_in)
        w = jax.random.uniform(kw, (c_out, c_in), jnp.float32, -bound, bound)
        b = jax.random.uniform(kb, (c_out,), jnp.float32, -bound, bound)
        params.append((w.astype(param_dtype), b.reshape(c_out, 1)))
    return params


def mlp_reference(x, params, io_dtype=jnp.float32):
    """Pure-JAX reference with the SAME cast pattern as the kernel:
    activations cast to the weight dtype right before each matmul, f32
    accumulation, f32 bias, ReLU after every layer, final cast to io_dtype."""
    h = x.astype(io_dtype)
    for (w, b) in params:
        y = jnp.dot(h.astype(w.dtype), w.T, preferred_element_type=jnp.float32)
        h = jnp.maximum(y + b.reshape(1, -1), 0.0)
    return h.astype(io_dtype)


# TODO(synk): act='leakyrelu'/'prelu' and norm in {batch, instance, layer, group,
# dgn} branches of the original module are not exercised by the default
# MLP(channels, act='relu', norm=None) config and are not implemented here.

if __name__ == "__main__":
    key = jax.random.PRNGKey(0)
    channels = [4, 32, 16]          # MLP(channels=[4, 32, 16])
    n_nodes = 1037                  # not a multiple of 128 -> exercises lane padding

    kx, kp = jax.random.split(key)
    x = jax.random.normal(kx, (n_nodes, channels[0]), jnp.float32)

    # ---- f32 params / f32 I/O, single-grid-step path ------------------------
    params_f32 = init_mlp_params(channels, kp, param_dtype=jnp.float32)
    out = jax.block_until_ready(mlp_forward(x, params_f32))
    ref = mlp_reference(x, params_f32, jnp.float32)
    assert out.shape == (n_nodes, channels[-1])
    assert jnp.allclose(out, ref, atol=1e-4, rtol=1e-4), \
        float(jnp.max(jnp.abs(out - ref)))

    # ---- bf16 params / bf16 I/O (f32 accumulate + f32 bias inside) ----------
    params_bf16 = init_mlp_params(channels, kp, param_dtype=jnp.bfloat16)
    out_bf16 = jax.block_until_ready(
        mlp_forward(x, params_bf16, io_dtype=jnp.bfloat16))
    ref_bf16 = mlp_reference(x, params_bf16, jnp.bfloat16)
    assert out_bf16.shape == (n_nodes, channels[-1])
    assert jnp.allclose(out_bf16.astype(jnp.float32),
                        ref_bf16.astype(jnp.float32), atol=5e-2, rtol=5e-2)

    # ---- larger N: multi-tile grid with an even tile count (v7x balance) ----
    n_big = 5000
    x_big = jax.random.normal(jax.random.PRNGKey(1), (n_big, channels[0]),
                              jnp.float32)
    out_big = jax.block_until_ready(mlp_forward(x_big, params_f32, tile_n=1024))
    ref_big = mlp_reference(x_big, params_f32, jnp.float32)
    assert out_big.shape == (n_big, channels[-1])
    assert jnp.allclose(out_big, ref_big, atol=1e-4, rtol=1e-4)

    print("KERNEL_OK")
</pallas_src>

<mosaic_0001>
module attributes {stable_mosaic.version = 11 : i64} {
  func.func @kernel(%arg0: i32, %arg1: memref<4x1152xf32, #tpu.memory_space<vmem>>, %arg2: memref<32x4xf32, #tpu.memory_space<vmem>>, %arg3: memref<32x1xf32, #tpu.memory_space<vmem>>, %arg4: memref<16x32xf32, #tpu.memory_space<vmem>>, %arg5: memref<16x1xf32, #tpu.memory_space<vmem>>, %arg6: memref<16x1152xf32, #tpu.memory_space<vmem>>) attributes {dimension_semantics = [#tpu.dimension_semantics<parallel>], iteration_bounds = array<i64: 1>, scalar_prefetch = 0 : i64, scratch_operands = 0 : i64, tpu.core_type = #tpu.core_type<tc>, window_params = [{transform_indices = @transform_0, window_bounds = array<i64: 4, 1152>}, {pipeline_mode = #tpu.pipeline_mode<synchronous>, transform_indices = @transform_1, window_bounds = array<i64: 32, 4>}, {pipeline_mode = #tpu.pipeline_mode<synchronous>, transform_indices = @transform_2, window_bounds = array<i64: 32, 1>}, {pipeline_mode = #tpu.pipeline_mode<synchronous>, transform_indices = @transform_3, window_bounds = array<i64: 16, 32>}, {pipeline_mode = #tpu.pipeline_mode<synchronous>, transform_indices = @transform_4, window_bounds = array<i64: 16, 1>}, {transform_indices = @transform_5, window_bounds = array<i64: 16, 1152>}]} {
    %c0 = arith.constant 0 : index
    %c0_0 = arith.constant 0 : index
    %0 = vector.load %arg1[%c0, %c0_0] : memref<4x1152xf32, #tpu.memory_space<vmem>>, vector<4x1152xf32>
    %c0_1 = arith.constant 0 : index
    %c0_2 = arith.constant 0 : index
    %1 = vector.load %arg2[%c0_1, %c0_2] : memref<32x4xf32, #tpu.memory_space<vmem>>, vector<32x4xf32>
    %c0_3 = arith.constant 0 : index
    %c0_4 = arith.constant 0 : index
    %2 = vector.load %arg3[%c0_3, %c0_4] : memref<32x1xf32, #tpu.memory_space<vmem>>, vector<32x1xf32>
    %cst = arith.constant dense<0.000000e+00> : vector<32x1152xf32>
    %3 = tpu.matmul %1, %0, %cst {dimension_numbers = #tpu.dot_dimension_numbers<[1], [0], [0], [1], [0, 0, 1, 1], [], []>} : vector<32x4xf32>, vector<4x1152xf32>, vector<32x1152xf32> -> vector<32x1152xf32>
    %4 = vector.broadcast %2 : vector<32x1xf32> to vector<32x1152xf32>
    %5 = arith.addf %3, %4 : vector<32x1152xf32>
    %cst_5 = arith.constant 0.000000e+00 : f32
    %6 = vector.broadcast %cst_5 : f32 to vector<32x1152xf32>
    %7 = arith.maximumf %5, %6 : vector<32x1152xf32>
    %c0_6 = arith.constant 0 : index
    %c0_7 = arith.constant 0 : index
    %8 = vector.load %arg4[%c0_6, %c0_7] : memref<16x32xf32, #tpu.memory_space<vmem>>, vector<16x32xf32>
    %c0_8 = arith.constant 0 : index
    %c0_9 = arith.constant 0 : index
    %9 = vector.load %arg5[%c0_8, %c0_9] : memref<16x1xf32, #tpu.memory_space<vmem>>, vector<16x1xf32>
    %cst_10 = arith.constant dense<0.000000e+00> : vector<16x1152xf32>
    %10 = tpu.matmul %8, %7, %cst_10 {dimension_numbers = #tpu.dot_dimension_numbers<[1], [0], [0], [1], [0, 0, 1, 1], [], []>} : vector<16x32xf32>, vector<32x1152xf32>, vector<16x1152xf32> -> vector<16x1152xf32>
    %11 = vector.broadcast %9 : vector<16x1xf32> to vector<16x1152xf32>
    %12 = arith.addf %10, %11 : vector<16x1152xf32>
    %cst_11 = arith.constant 0.000000e+00 : f32
    %13 = vector.broadcast %cst_11 : f32 to vector<16x1152xf32>
    %14 = arith.maximumf %12, %13 : vector<16x1152xf32>
    %c0_12 = arith.constant 0 : index
    %c0_13 = arith.constant 0 : index
    %15 = vector.load %arg6[%c0_12, %c0_13] : memref<16x1152xf32, #tpu.memory_space<vmem>>, vector<16x1152xf32>
    tpu.vector_store %arg6[%c0_12, %c0_13], %14 {strides = array<i32>} : memref<16x1152xf32, #tpu.memory_space<vmem>>, vector<16x1152xf32>,
    return
  }
  func.func @transform_0(%arg0: i32) -> (i32, i32) {
    %c0_i32 = arith.constant 0 : i32
    %c0_i32_0 = arith.constant 0 : i32
    return %c0_i32, %arg0 : i32, i32
  }
  func.func @transform_1(%arg0: i32) -> (i32, i32) {
    %c0_i32 = arith.constant 0 : i32
    %c0_i32_0 = arith.constant 0 : i32
    %c0_i32_1 = arith.constant 0 : i32
    return %c0_i32, %c0_i32_0 : i32, i32
  }
  func.func @transform_2(%arg0: i32) -> (i32, i32) {
    %c0_i32 = arith.constant 0 : i32
    %c0_i32_0 = arith.constant 0 : i32
    %c0_i32_1 = arith.constant 0 : i32
    return %c0_i32, %c0_i32_0 : i32, i32
  }
  func.func @transform_3(%arg0: i32) -> (i32, i32) {
    %c0_i32 = arith.constant 0 : i32
    %c0_i32_0 = arith.constant 0 : i32
    %c0_i32_1 = arith.constant 0 : i32
    return %c0_i32, %c0_i32_0 : i32, i32
  }
  func.func @transform_4(%arg0: i32) -> (i32, i32) {
    %c0_i32 = arith.constant 0 : i32
    %c0_i32_0 = arith.constant 0 : i32
    %c0_i32_1 = arith.constant 0 : i32
    return %c0_i32, %c0_i32_0 : i32, i32
  }
  func.func @transform_5(%arg0: i32) -> (i32, i32) {
    %c0_i32 = arith.constant 0 : i32
    %c0_i32_0 = arith.constant 0 : i32
    return %c0_i32, %arg0 : i32, i32
  }
}

</mosaic_0001>

<bundles_post_ra>
// kernel: tpu_custom_call.1
= control target key start
LH: loop header
LB: loop body
LE: loop exit
PB: predicated region body
PF: predicated region fallthrough
CT: control target
= control target key end

     0   :  { %v787_v3 = vmov 0   ;;  %s1015_s0 = inlined_call_operand.vmem [shape: f32[4,1152], index: 0, kind: input, shape index: {}]   ;;  %s1016_s1 = inlined_call_operand.vmem [shape: f32[32,4], index: 1, kind: input, shape index: {}]   ;;  %s1017_s2 = inlined_call_operand.vmem [shape: f32[32,1], index: 2, kind: input, shape index: {}]   ;;  %s1018_s3 = inlined_call_operand.vmem [shape: f32[16,32], index: 3, kind: input, shape index: {}]   ;;  %s1019_s4 = inlined_call_operand.vmem [shape: f32[16,1], index: 4, kind: input, shape index: {}]   ;;  %s1020_s5 = inlined_call_operand.hbm [shape: f32[16,1152], index: 5, kind: output, shape index: {}]  }
   0x1   :  { %v21_v0 = vld [vmem:[%s1015_s0] sm:$0xff]  ;;  %v22_v1 = vld [vmem:[%s1015_s0 + $0x8] sm:$0xff]  ;;  %759 = vset.pattern.permute.xlu1 %v787_v3  ;;  %v23_v4 = vld [vmem:[%s1015_s0 + $0x10] sm:$0xff]  ;;  %758 = vset.pattern.permute.xlu0 %v787_v3 }
   0x2   :  { %59 = vst [vmem:[#allocation1] ss:$2 sm:$0xff] %v21_v0  ;;  %v31_v2 = vld [vmem:[%s1017_s2 + $0x8] sm:$0xff]  ;;  %v33_v5 = vld [vmem:[%s1017_s2 + $0x18] sm:$0xff]  ;;  %760 = vset.pattern.permute.xlu2 %v787_v3 }
   0x3   :  { %61 = vst [vmem:[#allocation1 + $0x10] ss:$2 sm:$0xff] %v22_v1  ;;  %41 = vperm.xlu1 %759, %v31_v2   ;;  %v24_v6 = vld [vmem:[%s1015_s0 + $0x18] sm:$0xff]  ;;  %51 = vperm.xlu0 %758, %v33_v5  }
   0x4   :  { %63 = vst [vmem:[#allocation1 + $0x20] ss:$2 sm:$0xff] %v23_v4 }
   0x5   :  { %65 = vst [vmem:[#allocation1 + $0x30] ss:$2 sm:$0xff] %v24_v6 }
   0x6   :  { %10 = vsyncpa [#allocation3], 0  ;;  %vm89_vm0 = vcmask 1043456   ;;  %v25_v7 = vld [vmem:[%s1015_s0 + $0x20] sm:$0xf]  ;;  %vm76_vm1 = vcmask 31744  }
   0x7   :  { %v26_v8 = vld [vmem:[%s1016_s1] sm:$0xff]  ;;  %v32_v15 = vld [vmem:[%s1017_s2 + $0x10] sm:$0xff]  ;;  %v27_v19 = vld [vmem:[%s1016_s1 + $0x8] sm:$0xff]  ;;  %vm419_vm2 = vcmask 261120   ;;  %s675_s26 = sshll.u32 %s1020_s5, 4  ;;  %s789_s27 = smov 1152   ;;  %s676_s26 = int_to_ptr.hbm [resolvable:$true] %s675_s26 }
   0x8   :  { %v30_v12 = vld [vmem:[%s1017_s2] sm:$0xff]  ;;  %v28_v21 = vld [vmem:[%s1016_s1 + $0x10] sm:$0xff]  ;;  %v29_v22 = vld [vmem:[%s1016_s1 + $0x18] sm:$0xff]  ;;  %s790_s28 = smov 72  }
   0x9   :  { %v66_v9 = vld.sshfl [vmem:[#allocation1] sm:$0xff pattern:$0x75316420]  ;;  %v67_v10 = vld.sshfl [vmem:[#allocation1 + $0x8] sm:$0xff pattern:$0x75316420] }
   0xa   :  { %687 = vmatpush.msk.msra.mxu0 %vm89_vm0, %v66_v9  ;;  %74 = vst [vmem:[#allocation1] ss:$2 sm:$0xff] %v25_v7  ;;  %692 = vmatpush.msk.msra.mxu1 %vm89_vm0, %v67_v10  ;;  %v68_v11 = vld.sshfl [vmem:[#allocation1 + $0x10] sm:$0xff pattern:$0x75316420]  ;;  %v932_v9 = vld [vmem:[%s1018_s3] sm:$0xff] }
   0xb   :  { %697 = vmatpush.msk.msra.mxu2 %vm89_vm0, %v68_v11  ;;  %v69_v13 = vld.sshfl [vmem:[#allocation1 + $0x18] sm:$0xff pattern:$0x75316420]  ;;  %688 = vmatmul.msk.f32.vlgmr.msra.gmra.mxu0 %vm76_vm1, %v26_v8  ;;  %v70_v14 = vld.sshfl [vmem:[#allocation1 + $0x20] sm:$0xff pattern:$0x75316420] }
   0xc   :  { %702 = vmatpush.msk.msra.mxu3 %vm89_vm0, %v69_v13  ;;  %693 = vmatmul.msk.f32.vlgmr.msra.gmra.mxu1 %vm76_vm1, %v26_v8  ;;  %v71_v16 = vld.sshfl [vmem:[#allocation1 + $0x28] sm:$0xff pattern:$0x75316420]  ;;  %v72_v17 = vld.sshfl [vmem:[#allocation1 + $0x30] sm:$0xff pattern:$0x75316420] }
   0xd   :  { %698 = vmatmul.msk.f32.vlgmr.msra.gmra.mxu2 %vm76_vm1, %v26_v8  ;;  %703 = vmatmul.msk.f32.vlgmr.msra.gmra.mxu3 %vm76_vm1, %v26_v8  ;;  %v73_v18 = vld.sshfl [vmem:[#allocation1 + $0x38] sm:$0xff pattern:$0x75316420] }
   0xe   :  { %707 = vmatpush.msk.msrb.mxu0 %vm89_vm0, %v70_v14  ;;  %36 = vperm.xlu1 %759, %v30_v12  }
   0xf   :  { %46 = vperm.xlu0 %758, %v32_v15   ;;  %712 = vmatpush.msk.msrb.mxu1 %vm89_vm0, %v71_v16 }
  0x10   :  { %717 = vmatpush.msk.msrb.mxu2 %vm89_vm0, %v72_v17  ;;  %722 = vmatpush.msk.msrb.mxu3 %vm89_vm0, %v73_v18  ;;  %v941_v18 = vld [vmem:[%s1018_s3 + $0x8] sm:$0xff] }
  0x11   :  { %v75_v20 = vld.sshfl [vmem:[#allocation1] sm:$0xff pattern:$0x75316420] }
  0x12   :  { %727 = vmatpush.msk.msra.mxu0 %vm89_vm0, %v75_v20 }
  0x13   :  { %689 = vmatmul.msk.f32.gmra.mxu0 %vm76_vm1, %v27_v19 }
  0x14   :  { %694 = vmatmul.msk.f32.gmra.mxu1 %vm76_vm1, %v27_v19 }
  0x15   :  { %699 = vmatmul.msk.f32.gmra.mxu2 %vm76_vm1, %v27_v19  ;;  %704 = vmatmul.msk.f32.gmra.mxu3 %vm76_vm1, %v27_v19 }
  0x1b   :  { %690 = vmatmul.msk.f32.gmra.mxu0 %vm76_vm1, %v28_v21 }
  0x1c   :  { %695 = vmatmul.msk.f32.gmra.mxu1 %vm76_vm1, %v28_v21 }
  0x1d   :  { %700 = vmatmul.msk.f32.gmra.mxu2 %vm76_vm1, %v28_v21  ;;  %705 = vmatmul.msk.f32.gmra.mxu3 %vm76_vm1, %v28_v21 }
  0x23   :  { %691 = vmatmul.msk.f32.gmra.mxu0 %vm76_vm1, %v29_v22 }
  0x24   :  { %696 = vmatmul.msk.f32.gmra.mxu1 %vm76_vm1, %v29_v22 }
  0x25   :  { %701 = vmatmul.msk.f32.gmra.mxu2 %vm76_vm1, %v29_v22  ;;  %706 = vmatmul.msk.f32.gmra.mxu3 %vm76_vm1, %v29_v22 }
  0x2b   :  { %708 = vmatmul.msk.f32.vlgmr.msrb.gmra.mxu0 %vm76_vm1, %v26_v8 }
  0x2c   :  { %713 = vmatmul.msk.f32.vlgmr.msrb.gmra.mxu1 %vm76_vm1, %v26_v8 }
  0x2d   :  { %718 = vmatmul.msk.f32.vlgmr.msrb.gmra.mxu2 %vm76_vm1, %v26_v8  ;;  %723 = vmatmul.msk.f32.vlgmr.msrb.gmra.mxu3 %vm76_vm1, %v26_v8 }
  0x33   :  { %709 = vmatmul.msk.f32.gmra.mxu0 %vm76_vm1, %v27_v19 }
  0x34   :  { %714 = vmatmul.msk.f32.gmra.mxu1 %vm76_vm1, %v27_v19 }
  0x35   :  { %719 = vmatmul.msk.f32.gmra.mxu2 %vm76_vm1, %v27_v19  ;;  %724 = vmatmul.msk.f32.gmra.mxu3 %vm76_vm1, %v27_v19 }
  0x3b   :  { %710 = vmatmul.msk.f32.gmra.mxu0 %vm76_vm1, %v28_v21 }
  0x3c   :  { %715 = vmatmul.msk.f32.gmra.mxu1 %vm76_vm1, %v28_v21 }
  0x3d   :  { %720 = vmatmul.msk.f32.gmra.mxu2 %vm76_vm1, %v28_v21  ;;  %725 = vmatmul.msk.f32.gmra.mxu3 %vm76_vm1, %v28_v21 }
  0x43   :  { %711 = vmatmul.msk.f32.gmra.mxu0 %vm76_vm1, %v29_v22 }
  0x44   :  { %716 = vmatmul.msk.f32.gmra.mxu1 %vm76_vm1, %v29_v22 }
  0x45   :  { %721 = vmatmul.msk.f32.gmra.mxu2 %vm76_vm1, %v29_v22  ;;  %726 = vmatmul.msk.f32.gmra.mxu3 %vm76_vm1, %v29_v22 }
  0x4b   :  { %728 = vmatmul.msk.f32.vlgmr.msra.gmra.mxu0 %vm76_vm1, %v26_v8 }
  0x53   :  { %729 = vmatmul.msk.f32.gmra.mxu0 %vm76_vm1, %v27_v19 }
  0x5b   :  { %730 = vmatmul.msk.f32.gmra.mxu0 %vm76_vm1, %v28_v21 }
  0x63   :  { %731 = vmatmul.msk.f32.gmra.mxu0 %vm76_vm1, %v29_v22 }
  0x75   :  { %v905_v29 = vpop.permute.xlu1 %41  ;;  %v907_v30 = vpop.permute.xlu0 %51 }
  0x80   :  { %v909_v35 = vpop.permute.xlu1 %36 }
  0x81   :  { %v911_v36 = vpop.permute.xlu0 %46 }
  0x88   :  { %v125_v23 = vpop.f32.mrf.mxu0 }
  0x89   :  { %v154_v24 = vpop.f32.mrf.mxu1  ;;  %v126_v46 = vadd.f32 %v125_v23, %v909_v35 }
  0x8a   :  { %v155_v51 = vadd.f32 %v154_v24, %v909_v35 }
  0x8b   :  { %v369_v56 = vmax.f32 %v126_v46, 0.0 }
  0x8c   :  { %v370_v2 = vmax.f32 %v155_v51, 0.0 }
  0x90   :  { %v183_v25 = vpop.f32.mrf.mxu2  ;;  %v212_v26 = vpop.f32.mrf.mxu3 }
  0x91   :  { %v128_v27 = vpop.f32.mrf.mxu0  ;;  %v157_v28 = vpop.f32.mrf.mxu1  ;;  %v184_v3 = vadd.f32 %v183_v25, %v909_v35  ;;  %v213_v4 = vadd.f32 %v212_v26, %v909_v35 }
  0x92   :  { %v158_v42 = vadd.f32 %v157_v28, %v905_v29  ;;  %v129_v47 = vadd.f32 %v128_v27, %v905_v29 }
  0x93   :  { %v371_v12 = vmax.f32 %v184_v3, 0.0  ;;  %v372_v13 = vmax.f32 %v213_v4, 0.0  ;;  %v407_v3 = vld [vmem:[%s1019_s4] sm:$0xff] }
  0x94   :  { %v379_v52 = vmax.f32 %v158_v42, 0.0  ;;  %v378_v57 = vmax.f32 %v129_v47, 0.0  ;;  %411 = vperm.xlu2 %760, %v407_v3  }
  0x98   :  { %v186_v31 = vpop.f32.mrf.mxu2  ;;  %v215_v32 = vpop.f32.mrf.mxu3 }
  0x99   :  { %v131_v33 = vpop.f32.mrf.mxu0  ;;  %v160_v34 = vpop.f32.mrf.mxu1  ;;  %v187_v60 = vadd.f32 %v186_v31, %v905_v29  ;;  %v216_v61 = vadd.f32 %v215_v32, %v905_v29 }
  0x9a   :  { %v161_v37 = vadd.f32 %v160_v34, %v911_v36  ;;  %v132_v43 = vadd.f32 %v131_v33, %v911_v36 }
  0x9b   :  { %v380_v10 = vmax.f32 %v187_v60, 0.0  ;;  %v381_v11 = vmax.f32 %v216_v61, 0.0 }
  0x9c   :  { %v388_v48 = vmax.f32 %v161_v37, 0.0  ;;  %v387_v53 = vmax.f32 %v132_v43, 0.0 }
  0xa0   :  { %v189_v38 = vpop.f32.mrf.mxu2  ;;  %v218_v39 = vpop.f32.mrf.mxu3 }
  0xa1   :  { %v134_v40 = vpop.f32.mrf.mxu0  ;;  %v163_v41 = vpop.f32.mrf.mxu1  ;;  %v190_v54 = vadd.f32 %v189_v38, %v911_v36  ;;  %v219_v55 = vadd.f32 %v218_v39, %v911_v36 }
  0xa2   :  { %v135_v44 = vadd.f32 %v134_v40, %v907_v30  ;;  %v164_v45 = vadd.f32 %v163_v41, %v907_v30 }
  0xa3   :  { %v389_v5 = vmax.f32 %v190_v54, 0.0  ;;  %v390_v6 = vmax.f32 %v219_v55, 0.0 }
  0xa4   :  { %v396_v49 = vmax.f32 %v135_v44, 0.0  ;;  %v397_v50 = vmax.f32 %v164_v45, 0.0 }
  0xa6   :  { %438 = vmatpush.msra.mxu1 %v396_v49  ;;  %461 = vmatpush.msra.mxu2 %v397_v50 }
  0xa8   :  { %v192_v58 = vpop.f32.mrf.mxu2  ;;  %v221_v59 = vpop.f32.mrf.mxu3  ;;  %439 = vmatpush.msra.mxu1 %v387_v53  ;;  %462 = vmatpush.msra.mxu2 %v388_v48 }
  0xa9   :  { %v193_v62 = vadd.f32 %v192_v58, %v907_v30  ;;  %v222_v63 = vadd.f32 %v221_v59, %v907_v30  ;;  %v241_v0 = vpop.f32.mrf.mxu0  ;;  %v270_v1 = vpop.f32.mrf.mxu1 }
  0xaa   :  { %440 = vmatpush.msra.mxu1 %v378_v57  ;;  %463 = vmatpush.msra.mxu2 %v379_v52  ;;  %v242_v39 = vadd.f32 %v241_v0, %v909_v35  ;;  %v271_v40 = vadd.f32 %v270_v1, %v909_v35 }
  0xab   :  { %v398_v7 = vmax.f32 %v193_v62, 0.0  ;;  %v399_v8 = vmax.f32 %v222_v63, 0.0 }
  0xac   :  { %441 = vmatpush.msra.mxu1 %v369_v56  ;;  %464 = vmatpush.msra.mxu2 %v370_v2  ;;  %v373_v52 = vmax.f32 %v242_v39, 0.0  ;;  %v374_v53 = vmax.f32 %v271_v40, 0.0 }
  0xad   :  { %484 = vmatpush.msra.mxu3 %v398_v7  ;;  %732 = vmatmul.msk.f32.vlgmr.msra.gmra.mxu1 %vm419_vm2, %v932_v9 }
  0xae   :  { %507 = vmatpush.msrb.mxu1 %v399_v8  ;;  %734 = vmatmul.msk.f32.vlgmr.msra.gmra.mxu2 %vm419_vm2, %v932_v9 }
  0xaf   :  { %485 = vmatpush.msra.mxu3 %v389_v5  ;;  %v408_v5 = vld [vmem:[%s1019_s4 + $0x8] sm:$0xff]  ;;  %s788_s4 = smov [#allocation2]  }
  0xb0   :  { %508 = vmatpush.msrb.mxu1 %v390_v6  ;;  %v299_v14 = vpop.f32.mrf.mxu2  ;;  %v328_v15 = vpop.f32.mrf.mxu3  ;;  %416 = vperm.xlu2 %760, %v408_v5   ;;  %s673_s23 = sshll.u32 %s788_s4, 4  ;;  %s674_s23 = int_to_ptr.vmem [resolvable:$true] %s673_s23 }
  0xb1   :  { %486 = vmatpush.msra.mxu3 %v380_v10  ;;  %v244_v16 = vpop.f32.mrf.mxu0  ;;  %v273_v17 = vpop.f32.mrf.mxu1  ;;  %v300_v58 = vadd.f32 %v299_v14, %v909_v35  ;;  %v329_v59 = vadd.f32 %v328_v15, %v909_v35 }
  0xb2   :  { %509 = vmatpush.msrb.mxu1 %v381_v11  ;;  %v245_v33 = vadd.f32 %v244_v16, %v905_v29  ;;  %v274_v34 = vadd.f32 %v273_v17, %v905_v29 }
  0xb3   :  { %487 = vmatpush.msra.mxu3 %v371_v12  ;;  %v375_v0 = vmax.f32 %v300_v58, 0.0  ;;  %v376_v1 = vmax.f32 %v329_v59, 0.0 }
  0xb4   :  { %510 = vmatpush.msrb.mxu1 %v372_v13  ;;  %736 = vmatmul.msk.f32.vlgmr.msra.gmra.mxu3 %vm419_vm2, %v932_v9  ;;  %v382_v43 = vmax.f32 %v245_v33, 0.0  ;;  %v383_v44 = vmax.f32 %v274_v34, 0.0 }
  0xb5   :  { %733 = vmatmul.msk.f32.gmra.mxu1 %vm419_vm2, %v941_v18 }
  0xb6   :  { %735 = vmatmul.msk.f32.gmra.mxu2 %vm419_vm2, %v941_v18 }
  0xb8   :  { %v302_v19 = vpop.f32.mrf.mxu2  ;;  %v331_v20 = vpop.f32.mrf.mxu3 }
  0xb9   :  { %v247_v21 = vpop.f32.mrf.mxu0  ;;  %v276_v22 = vpop.f32.mrf.mxu1  ;;  %v303_v54 = vadd.f32 %v302_v19, %v905_v29  ;;  %v332_v55 = vadd.f32 %v331_v20, %v905_v29 }
  0xba   :  { %v248_v27 = vadd.f32 %v247_v21, %v911_v36  ;;  %v277_v28 = vadd.f32 %v276_v22, %v911_v36 }
  0xbb   :  { %v384_v62 = vmax.f32 %v303_v54, 0.0  ;;  %v385_v63 = vmax.f32 %v332_v55, 0.0 }
  0xbc   :  { %737 = vmatmul.msk.f32.gmra.mxu3 %vm419_vm2, %v941_v18  ;;  %v391_v41 = vmax.f32 %v248_v27, 0.0  ;;  %v392_v42 = vmax.f32 %v277_v28, 0.0 }
  0xbd   :  { %738 = vmatmul.msk.f32.vlgmr.msrb.gmra.mxu1 %vm419_vm2, %v932_v9 }
  0xc0   :  { %v305_v23 = vpop.f32.mrf.mxu2  ;;  %v334_v24 = vpop.f32.mrf.mxu3 }
  0xc1   :  { %v250_v25 = vpop.f32.mrf.mxu0  ;;  %v279_v26 = vpop.f32.mrf.mxu1  ;;  %v306_v47 = vadd.f32 %v305_v23, %v911_v36  ;;  %v335_v48 = vadd.f32 %v334_v24, %v911_v36 }
  0xc2   :  { %v251_v31 = vadd.f32 %v250_v25, %v907_v30  ;;  %v280_v32 = vadd.f32 %v279_v26, %v907_v30 }
  0xc3   :  { %v393_v60 = vmax.f32 %v306_v47, 0.0  ;;  %v394_v61 = vmax.f32 %v335_v48, 0.0 }
  0xc4   :  { %v400_v37 = vmax.f32 %v251_v31, 0.0  ;;  %v401_v38 = vmax.f32 %v280_v32, 0.0 }
  0xc5   :  { %739 = vmatmul.msk.f32.gmra.mxu1 %vm419_vm2, %v941_v18 }
  0xc6   :  { %530 = vmatpush.msrb.mxu2 %v400_v37  ;;  %553 = vmatpush.msrb.mxu3 %v401_v38 }
  0xc8   :  { %v308_v45 = vpop.f32.mrf.mxu2  ;;  %v337_v46 = vpop.f32.mrf.mxu3  ;;  %531 = vmatpush.msrb.mxu2 %v391_v41  ;;  %554 = vmatpush.msrb.mxu3 %v392_v42 }
  0xc9   :  { %v309_v49 = vadd.f32 %v308_v45, %v907_v30  ;;  %v338_v50 = vadd.f32 %v337_v46, %v907_v30  ;;  %v357_v51 = vpop.f32.mrf.mxu0 }
  0xca   :  { %532 = vmatpush.msrb.mxu2 %v382_v43  ;;  %555 = vmatpush.msrb.mxu3 %v383_v44  ;;  %v358_v12 = vadd.f32 %v357_v51, %v909_v35 }
  0xcb   :  { %v402_v56 = vmax.f32 %v309_v49, 0.0  ;;  %v403_v57 = vmax.f32 %v338_v50, 0.0 }
  0xcc   :  { %533 = vmatpush.msrb.mxu2 %v373_v52  ;;  %556 = vmatpush.msrb.mxu3 %v374_v53  ;;  %v377_v15 = vmax.f32 %v358_v12, 0.0 }
  0xcd   :  { %576 = vmatpush.msrb.mxu0 %v402_v56  ;;  %599 = vmatpush.msra.mxu1 %v403_v57 }
  0xce   :  { %750 = vmatpush.msra.mxu3 %v402_v56  ;;  %740 = vmatmul.msk.f32.vlgmr.msrb.gmra.mxu2 %vm419_vm2, %v932_v9 }
  0xcf   :  { %577 = vmatpush.msrb.mxu0 %v393_v60  ;;  %600 = vmatpush.msra.mxu1 %v394_v61 }
  0xd0   :  { %751 = vmatpush.msra.mxu3 %v393_v60 }
  0xd1   :  { %578 = vmatpush.msrb.mxu0 %v384_v62  ;;  %601 = vmatpush.msra.mxu1 %v385_v63  ;;  %v360_v2 = vpop.f32.mrf.mxu0 }
  0xd2   :  { %752 = vmatpush.msra.mxu3 %v384_v62  ;;  %v361_v10 = vadd.f32 %v360_v2, %v905_v29 }
  0xd3   :  { %579 = vmatpush.msrb.mxu0 %v375_v0  ;;  %602 = vmatpush.msra.mxu1 %v376_v1 }
  0xd4   :  { %753 = vmatpush.msra.mxu3 %v375_v0  ;;  %746 = vmatmul.msk.f32.vlgmr.msra.gmra.mxu1 %vm419_vm2, %v932_v9  ;;  %v386_v14 = vmax.f32 %v361_v10, 0.0 }
  0xd5   :  { %742 = vmatmul.msk.f32.vlgmr.msrb.gmra.mxu3 %vm419_vm2, %v932_v9  ;;  %744 = vmatmul.msk.f32.vlgmr.msrb.gmra.mxu0 %vm419_vm2, %v932_v9 }
  0xd6   :  { %741 = vmatmul.msk.f32.gmra.mxu2 %vm419_vm2, %v941_v18 }
  0xd9   :  { %v363_v4 = vpop.f32.mrf.mxu0 }
  0xda   :  { %v364_v7 = vadd.f32 %v363_v4, %v911_v36 }
  0xdc   :  { %747 = vmatmul.msk.f32.gmra.mxu1 %vm419_vm2, %v941_v18  ;;  %v395_v13 = vmax.f32 %v364_v7, 0.0 }
  0xdd   :  { %743 = vmatmul.msk.f32.gmra.mxu3 %vm419_vm2, %v941_v18 }
  0xe1   :  { %v366_v6 = vpop.f32.mrf.mxu0 }
  0xe2   :  { %v367_v8 = vadd.f32 %v366_v6, %v907_v30 }
  0xe4   :  { %v404_v11 = vmax.f32 %v367_v8, 0.0 }
  0xe5   :  { %745 = vmatmul.msk.f32.vlgmr.msra.gmra.mxu3 %vm419_vm2, %v941_v18 }
  0xe6   :  { %622 = vmatpush.msra.mxu2 %v404_v11 }
  0xe8   :  { %623 = vmatpush.msra.mxu2 %v395_v13 }
  0xea   :  { %624 = vmatpush.msra.mxu2 %v386_v14 }
  0xec   :  { %625 = vmatpush.msra.mxu2 %v377_v15 }
  0xed   :  { %748 = vmatmul.msk.f32.vlgmr.msra.gmra.mxu2 %vm419_vm2, %v932_v9 }
  0xee   :  { %v1001_v30 = vpop.permute.xlu2 %411 }
  0xf5   :  { %749 = vmatmul.msk.f32.gmra.mxu2 %vm419_vm2, %v941_v18 }
 0x10a   :  { %v417_v9 = vpop.permute.xlu2 %416 }
 0x12a   :  { %v443_v29 = vpop.f32.mrf.mxu1 }
 0x12b   :  { %v444_v16 = vadd.f32 %v443_v29, %v1001_v30 }
 0x12d   :  { %v633_v17 = vmax.f32 %v444_v16, 0.0 }
 0x12f   :  { %651 = vst [vmem:[#allocation2] sm:$0xff] %v633_v17 }
 0x131   :  { %v466_v36 = vpop.f32.mrf.mxu2 }
 0x132   :  { %v467_v35 = vadd.f32 %v466_v36, %v1001_v30  ;;  %v446_v19 = vpop.f32.mrf.mxu1 }
 0x133   :  { %v447_v24 = vadd.f32 %v446_v19, %v417_v9 }
 0x134   :  { %v634_v20 = vmax.f32 %v467_v35, 0.0 }
 0x135   :  { %v642_v26 = vmax.f32 %v447_v24, 0.0 }
 0x136   :  { %652 = vst [vmem:[#allocation2 + $0x8] sm:$0xff] %v634_v20 }
 0x137   :  { %v489_v21 = vpop.f32.mrf.mxu3  ;;  %660 = vst [vmem:[#allocation2 + $0x48] sm:$0xff] %v642_v26 }
 0x138   :  { %v490_v22 = vadd.f32 %v489_v21, %v1001_v30 }
 0x139   :  { %v469_v23 = vpop.f32.mrf.mxu2 }
 0x13a   :  { %v635_v18 = vmax.f32 %v490_v22, 0.0  ;;  %v470_v25 = vadd.f32 %v469_v23, %v417_v9  ;;  %v512_v27 = vpop.f32.mrf.mxu1 }
 0x13b   :  { %v513_v31 = vadd.f32 %v512_v27, %v1001_v30 }
 0x13c   :  { %653 = vst [vmem:[#allocation2 + $0x10] sm:$0xff] %v635_v18  ;;  %v643_v28 = vmax.f32 %v470_v25, 0.0 }
 0x13d   :  { %v636_v32 = vmax.f32 %v513_v31, 0.0 }
 0x13e   :  { %661 = vst [vmem:[#allocation2 + $0x50] sm:$0xff] %v643_v28 }
 0x13f   :  { %v492_v33 = vpop.f32.mrf.mxu3  ;;  %654 = vst [vmem:[#allocation2 + $0x18] sm:$0xff] %v636_v32 }
 0x140   :  { %v493_v34 = vadd.f32 %v492_v33, %v417_v9 }
 0x142   :  { %v644_v37 = vmax.f32 %v493_v34, 0.0  ;;  %v515_v38 = vpop.f32.mrf.mxu1 }
 0x143   :  { %v516_v39 = vadd.f32 %v515_v38, %v417_v9 }
 0x144   :  { %662 = vst [vmem:[#allocation2 + $0x58] sm:$0xff] %v644_v37 }
 0x145   :  { %v645_v40 = vmax.f32 %v516_v39, 0.0 }
 0x147   :  { %663 = vst [vmem:[#allocation2 + $0x60] sm:$0xff] %v645_v40 }
 0x151   :  { %v535_v41 = vpop.f32.mrf.mxu2  ;;  %v604_v42 = vpop.f32.mrf.mxu1 }
 0x152   :  { %v536_v43 = vadd.f32 %v535_v41, %v1001_v30  ;;  %v605_v44 = vadd.f32 %v604_v42, %v1001_v30  ;;  %v581_v45 = vpop.f32.mrf.mxu0 }
 0x153   :  { %v582_v46 = vadd.f32 %v581_v45, %v1001_v30 }
 0x154   :  { %v637_v47 = vmax.f32 %v536_v43, 0.0  ;;  %v640_v48 = vmax.f32 %v605_v44, 0.0 }
 0x155   :  { %v639_v49 = vmax.f32 %v582_v46, 0.0 }
 0x156   :  { %655 = vst [vmem:[#allocation2 + $0x20] sm:$0xff] %v637_v47 }
 0x157   :  { %658 = vst [vmem:[#allocation2 + $0x38] sm:$0xff] %v640_v48 }
 0x158   :  { %v558_v50 = vpop.f32.mrf.mxu3  ;;  %657 = vst [vmem:[#allocation2 + $0x30] sm:$0xff] %v639_v49 }
 0x159   :  { %v538_v51 = vpop.f32.mrf.mxu2  ;;  %v559_v52 = vadd.f32 %v558_v50, %v1001_v30  ;;  %v607_v53 = vpop.f32.mrf.mxu1 }
 0x15a   :  { %v539_v54 = vadd.f32 %v538_v51, %v417_v9  ;;  %v608_v55 = vadd.f32 %v607_v53, %v417_v9 }
 0x15b   :  { %v638_v56 = vmax.f32 %v559_v52, 0.0 }
 0x15c   :  { %v646_v57 = vmax.f32 %v539_v54, 0.0  ;;  %v649_v58 = vmax.f32 %v608_v55, 0.0 }
 0x15d   :  { %656 = vst [vmem:[#allocation2 + $0x28] sm:$0xff] %v638_v56 }
 0x15e   :  { %664 = vst [vmem:[#allocation2 + $0x68] sm:$0xff] %v646_v57 }
 0x15f   :  { %667 = vst [vmem:[#allocation2 + $0x80] sm:$0xff] %v649_v58 }
 0x160   :  { %v561_v59 = vpop.f32.mrf.mxu3 }
 0x161   :  { %v562_v60 = vadd.f32 %v561_v59, %v417_v9 }
 0x163   :  { %v647_v61 = vmax.f32 %v562_v60, 0.0 }
 0x165   :  { %665 = vst [vmem:[#allocation2 + $0x70] sm:$0xff] %v647_v61 }
 0x168   :  { %v584_v62 = vpop.f32.mrf.mxu3 }
 0x169   :  { %v585_v63 = vadd.f32 %v584_v62, %v417_v9 }
 0x16b   :  { %v648_v0 = vmax.f32 %v585_v63, 0.0 }
 0x16d   :  { %666 = vst [vmem:[#allocation2 + $0x78] sm:$0xff] %v648_v0 }
 0x170   :  { %v627_v1 = vpop.f32.mrf.mxu2 }
 0x171   :  { %v628_v2 = vadd.f32 %v627_v1, %v1001_v30 }
 0x173   :  { %v641_v3 = vmax.f32 %v628_v2, 0.0 }
 0x175   :  { %659 = vst [vmem:[#allocation2 + $0x40] sm:$0xff] %v641_v3 }
 0x178   :  { %v630_v4 = vpop.f32.mrf.mxu2 }
 0x179   :  { %v631_v5 = vadd.f32 %v630_v4, %v417_v9 }
 0x17b   :  { %v650_v6 = vmax.f32 %v631_v5, 0.0 }
 0x17d   :  { %668 = vst [vmem:[#allocation2 + $0x88] sm:$0xff] %v650_v6 }
 0x17e   :  { %681 = dma.vmem_to_hbm [thread:$0]  %s674_s23, 2304, %s676_s26, [#allocation3], %s789_s27, %s789_s27, %s790_s28  }
 0x17f   :  { %785 = dma.done.wait [#allocation3], 2304  }
 0x180   :  { %786 = vsyncadd [#allocation3], 4294964992 }
 0x181   :  { %686 = vsyncpa [#allocation3], 1 }

</bundles_post_ra>
